<compile_context>
chip_gen: v6e
topology: v6e:2x2x1
jax: 0.10.0
libtpu: 0.0.40
codegen_flags: <defaults>
</compile_context>

<pallas_src>
import functools

import jax
import jax.numpy as jnp
from jax.experimental import pallas as pl
from jax.experimental.pallas import tpu as pltpu


def _round_up(x, m):
    return (x + m - 1) // m * m


# ----------------------------------------------------------------------------
# Shared ODE solver body. `h_in_b` = x @ w_ih + bias is the loop-invariant input
# projection, computed once by the caller. `scale_b` is pre-broadcast.
# ----------------------------------------------------------------------------
def _solve(h0, h_in_b, w_hh, scale_b, delta_t, *, num_unfolds, method, mxu_dtype):
    def dfdt(h):
        h_rec = jnp.dot(h.astype(mxu_dtype), w_hh,
                        preferred_element_type=jnp.float32)
        return scale_b * jnp.tanh(h_in_b + h_rec) - h

    def euler(h):
        return h + delta_t * dfdt(h)

    def heun(h):
        k1 = dfdt(h)
        k2 = dfdt(h + delta_t * k1)
        return h + (delta_t * 0.5) * (k1 + k2)

    def rk4(h):
        # Incremental accumulation: only h, acc and one k live at a time.
        k = dfdt(h)
        acc = k
        k = dfdt(h + k * (delta_t * 0.5))
        acc = acc + 2.0 * k
        k = dfdt(h + k * (delta_t * 0.5))
        acc = acc + 2.0 * k
        k = dfdt(h + k * delta_t)
        acc = acc + k
        return h + (delta_t * (1.0 / 6.0)) * acc

    step = {'euler': euler, 'heun': heun, 'rk4': rk4}[method]

    h = h0
    for _ in range(num_unfolds):   # small static trip count -> fully unrolled
        h = step(h)
    return h


def _cost_estimate(bp, hp, num_unfolds, method, n_timesteps, mxu_bytes):
    stages = {'euler': 1, 'heun': 2, 'rk4': 4}[method]
    n_dfdt = n_timesteps * num_unfolds * stages
    n_dot = n_dfdt + n_timesteps
    flops = 2 * bp * hp * hp * n_dot + 10 * bp * hp * n_dfdt
    transcendentals = bp * hp * n_dfdt
    bytes_accessed = (2 * hp * hp * mxu_bytes
                      + 2 * hp * 4
                      + n_timesteps * bp * hp * (mxu_bytes + 4)
                      + bp * hp * 4)
    return pl.CostEstimate(flops=int(flops),
                           transcendentals=int(transcendentals),
                           bytes_accessed=int(bytes_accessed))


# ----------------------------------------------------------------------------
# Single-cell kernel (one forward() call of _ODERNNCell). Prefer the sequence
# kernel below whenever the caller loops over timesteps: this path pays launch
# + full weight DMA per call.
# ----------------------------------------------------------------------------
def _ode_rnn_kernel(delta_t_ref, x_ref, h0_ref, w_ih_ref, w_hh_ref,
                    bias_ref, scale_ref, out_ref,
                    *, num_unfolds, method, mxu_dtype):
    bp, hp = h0_ref.shape
    delta_t = delta_t_ref[0]
    w_hh = w_hh_ref[...]
    scale_b = jnp.broadcast_to(scale_ref[...], (bp, hp))   # hoisted broadcast

    # Hoisted loop-invariant input projection (f32 accumulation on the MXU).
    h_in_b = jnp.dot(x_ref[...], w_ih_ref[...],
                     preferred_element_type=jnp.float32) + bias_ref[...]

    h = _solve(h0_ref[...], h_in_b, w_hh, scale_b, delta_t,
               num_unfolds=num_unfolds, method=method, mxu_dtype=mxu_dtype)
    out_ref[...] = h.astype(out_ref.dtype)


def ode_rnn_cell(new_hidden_state, old_hidden_state, elapsed,
                 w_ih, w_hh, bias, scale, *,
                 num_unfolds, method, mxu_dtype=jnp.bfloat16):
    """Pallas wrapper matching _ODERNNCell.forward(new_h, old_h, elapsed)."""
    B, H = old_hidden_state.shape
    assert new_hidden_state.shape == (B, H)
    assert w_ih.shape == (H, H) and w_hh.shape == (H, H)

    Hp = _round_up(max(H, 128), 128)   # lane-dense: unmasked stores, MXU-friendly
    Bp = _round_up(max(B, 8), 8)       # full sublanes

    f32 = jnp.float32
    x_p = jnp.pad(new_hidden_state.astype(f32),
                  ((0, Bp - B), (0, Hp - H))).astype(mxu_dtype)
    h0_p = jnp.pad(old_hidden_state.astype(f32), ((0, Bp - B), (0, Hp - H)))
    w_ih_p = jnp.pad(w_ih.astype(f32), ((0, Hp - H), (0, Hp - H))).astype(mxu_dtype)
    w_hh_p = jnp.pad(w_hh.astype(f32), ((0, Hp - H), (0, Hp - H))).astype(mxu_dtype)
    bias_p = jnp.pad(bias.astype(f32), (0, Hp - H)).reshape(1, Hp)
    scale_p = jnp.pad(scale.astype(f32), (0, Hp - H)).reshape(1, Hp)

    delta_t = (jnp.asarray(elapsed, dtype=f32) / num_unfolds).reshape(1)

    kernel = functools.partial(_ode_rnn_kernel, num_unfolds=num_unfolds,
                               method=method, mxu_dtype=mxu_dtype)
    vmem = pltpu.MemorySpace.VMEM
    smem = pltpu.MemorySpace.SMEM

    out_p = pl.pallas_call(
        kernel,
        out_shape=jax.ShapeDtypeStruct((Bp, Hp), f32),
        in_specs=[
            pl.BlockSpec(memory_space=smem),   # delta_t (scalar)
            pl.BlockSpec(memory_space=vmem),   # new_hidden_state
            pl.BlockSpec(memory_space=vmem),   # old_hidden_state
            pl.BlockSpec(memory_space=vmem),   # w_ih
            pl.BlockSpec(memory_space=vmem),   # w_hh
            pl.BlockSpec(memory_space=vmem),   # bias
            pl.BlockSpec(memory_space=vmem),   # scale
        ],
        out_specs=pl.BlockSpec(memory_space=vmem),
        cost_estimate=_cost_estimate(Bp, Hp, num_unfolds, method, 1,
                                     jnp.dtype(mxu_dtype).itemsize),
    )(delta_t, x_p, h0_p, w_ih_p, w_hh_p, bias_p, scale_p)

    return out_p[:B, :H]


# ----------------------------------------------------------------------------
# Sequence-fused, time-chunked kernel: the whole per-timestep loop of the
# surrounding ODE-LSTM runs inside ONE pallas_call. Grid = (batch_blocks,
# time_chunks); weights VMEM-resident; hidden state carried in VMEM scratch.
# ----------------------------------------------------------------------------
def _ode_rnn_seq_kernel(delta_t_ref, x_ref, h0_ref, w_ih_ref, w_hh_ref,
                        bias_ref, scale_ref, out_ref, h_scr,
                        *, time_block, num_unfolds, method, mxu_dtype):
    c = pl.program_id(1)   # time-chunk index (sequential / "arbitrary")

    @pl.when(c == 0)
    def _():
        h_scr[...] = h0_ref[...]

    tb, bb, hp = x_ref.shape
    w_hh = w_hh_ref[...]
    scale_b = jnp.broadcast_to(scale_ref[...], (bb, hp))   # hoisted broadcast

    # Batched input projection for the whole chunk: one well-shaped matmul and
    # a single w_ih weight push per chunk instead of TB tiny dots.
    x_flat = x_ref[...].reshape(tb * bb, hp)
    h_in_all = (jnp.dot(x_flat, w_ih_ref[...],
                        preferred_element_type=jnp.float32)
                + bias_ref[...]).reshape(tb, bb, hp)

    h = h_scr[...]
    for s in range(time_block):            # static unroll over the chunk
        dt = delta_t_ref[c * time_block + s]
        h = _solve(h, h_in_all[s], w_hh, scale_b, dt,
                   num_unfolds=num_unfolds, method=method, mxu_dtype=mxu_dtype)
        out_ref[s] = h.astype(out_ref.dtype)
    h_scr[...] = h


def ode_rnn_cell_sequence(new_hidden_states, old_hidden_state, elapsed,
                          w_ih, w_hh, bias, scale, *,
                          num_unfolds, method, mxu_dtype=jnp.bfloat16,
                          time_block=None, batch_block=None):
    """Runs the cell over a whole [T, B, H] sequence in a single pallas_call."""
    T, B, H = new_hidden_states.shape
    assert old_hidden_state.shape == (B, H)
    assert w_ih.shape == (H, H) and w_hh.shape == (H, H)
    assert elapsed.shape == (T,)

    Hp = _round_up(max(H, 128), 128)
    Bp = _round_up(max(B, 8), 8)
    mxu_bytes = jnp.dtype(mxu_dtype).itemsize

    # Batch blocks (leading "parallel" grid axis -> v7x megacore sharding).
    if batch_block is None or batch_block % 8 != 0 or Bp % batch_block != 0:
        Bb = Bp
    else:
        Bb = batch_block
    n_b = Bp // Bb

    # Time chunk: amortize per-grid-step overhead; keep double-buffered chunk
    # traffic modest so it also fits v7x's smaller VMEM.
    if time_block is None:
        budget = 8 * 2**20
        tb_cap = max(1, budget // (4 * Bp * Hp * (mxu_bytes + 4)))
        time_block = int(min(T, 32, tb_cap))
    TB = max(1, int(time_block))
    n_chunks = -(-T // TB)
    T_pad = n_chunks * TB

    f32 = jnp.float32
    # Padded timesteps use delta_t = 0 -> exact no-op solver steps.
    x_p = jnp.pad(new_hidden_states.astype(f32),
                  ((0, T_pad - T), (0, Bp - B), (0, Hp - H))).astype(mxu_dtype)
    h0_p = jnp.pad(old_hidden_state.astype(f32), ((0, Bp - B), (0, Hp - H)))
    w_ih_p = jnp.pad(w_ih.astype(f32), ((0, Hp - H), (0, Hp - H))).astype(mxu_dtype)
    w_hh_p = jnp.pad(w_hh.astype(f32), ((0, Hp - H), (0, Hp - H))).astype(mxu_dtype)
    bias_p = jnp.pad(bias.astype(f32), (0, Hp - H)).reshape(1, Hp)
    scale_p = jnp.pad(scale.astype(f32), (0, Hp - H)).reshape(1, Hp)
    delta_t = jnp.pad(elapsed.astype(f32) / num_unfolds, (0, T_pad - T))

    kernel = functools.partial(_ode_rnn_seq_kernel, time_block=TB,
                               num_unfolds=num_unfolds, method=method,
                               mxu_dtype=mxu_dtype)

    # Explicit VMEM budget (weights resident + double-buffered x/out chunks).
    vmem_need = (2 * Hp * Hp * mxu_bytes
                 + 4 * TB * Bb * Hp * (mxu_bytes + 4)
                 + 4 * Bb * Hp * 4
                 + 8 * Hp * 4)
    vmem_limit = int(min(64 * 2**20, max(32 * 2**20, 2 * vmem_need)))

    grid_spec = pltpu.PrefetchScalarGridSpec(
        num_scalar_prefetch=1,                    # delta_t -> SMEM
        grid=(n_b, n_chunks),
        in_specs=[
            pl.BlockSpec((TB, Bb, Hp), lambda b, c, dt: (c, b, 0)),  # x chunk
            pl.BlockSpec((Bb, Hp), lambda b, c, dt: (b, 0)),         # h0 block
            pl.BlockSpec((Hp, Hp), lambda b, c, dt: (0, 0)),         # w_ih (resident)
            pl.BlockSpec((Hp, Hp), lambda b, c, dt: (0, 0)),         # w_hh (resident)
            pl.BlockSpec((1, Hp), lambda b, c, dt: (0, 0)),          # bias
            pl.BlockSpec((1, Hp), lambda b, c, dt: (0, 0)),          # scale
        ],
        out_specs=pl.BlockSpec((TB, Bb, Hp), lambda b, c, dt: (c, b, 0)),
        scratch_shapes=[pltpu.VMEM((Bb, Hp), jnp.float32)],          # carried h
    )

    out_p = pl.pallas_call(
        kernel,
        out_shape=jax.ShapeDtypeStruct((T_pad, Bp, Hp), f32),
        grid_spec=grid_spec,
        compiler_params=pltpu.CompilerParams(
            dimension_semantics=("parallel", "arbitrary"),
            vmem_limit_bytes=vmem_limit),
        cost_estimate=_cost_estimate(Bp, Hp, num_unfolds, method, T_pad,
                                     mxu_bytes),
    )(delta_t, x_p, h0_p, w_ih_p, w_hh_p, bias_p, scale_p)

    return out_p[:T, :B, :H]


# ----------------------------------------------------------------------------
# Pure-JAX references mirroring the PyTorch module (for verification).
# ----------------------------------------------------------------------------
def ode_rnn_cell_ref(new_h, old_h, elapsed, w_ih, w_hh, bias, scale,
                     *, num_unfolds, method):
    delta_t = elapsed / num_unfolds
    prec = jax.lax.Precision.HIGHEST

    def dfdt(h):
        h_in = jnp.dot(new_h, w_ih, precision=prec)
        h_rec = jnp.dot(h, w_hh, precision=prec)
        return scale * jnp.tanh(h_in + h_rec + bias) - h

    def euler(h):
        return h + delta_t * dfdt(h)

    def heun(h):
        k1 = dfdt(h)
        k2 = dfdt(h + delta_t * k1)
        return h + delta_t * 0.5 * (k1 + k2)

    def rk4(h):
        k1 = dfdt(h)
        k2 = dfdt(h + k1 * delta_t * 0.5)
        k3 = dfdt(h + k2 * delta_t * 0.5)
        k4 = dfdt(h + k3 * delta_t)
        return h + delta_t * (k1 + 2 * k2 + 2 * k3 + k4) / 6.0

    step = {'euler': euler, 'heun': heun, 'rk4': rk4}[method]
    h = old_h
    for _ in range(num_unfolds):
        h = step(h)
    return h


def ode_rnn_sequence_ref(xs, h0, elapsed, w_ih, w_hh, bias, scale,
                         *, num_unfolds, method):
    h = h0
    outs = []
    for t in range(xs.shape[0]):
        h = ode_rnn_cell_ref(xs[t], h, elapsed[t], w_ih, w_hh, bias, scale,
                             num_unfolds=num_unfolds, method=method)
        outs.append(h)
    return jnp.stack(outs)


if __name__ == "__main__":
    H = 32
    NUM_UNFOLDS = 4
    ELAPSED = 1.0

    key = jax.random.PRNGKey(0)
    k_hh, k_ih, k_x, k_h, k_xs, k_e, k_h0 = jax.random.split(key, 7)

    # Deterministic params mirroring _reset_parameters(): orthogonal w_hh,
    # xavier-uniform w_ih, zero bias, unit scale.
    w_hh, _ = jnp.linalg.qr(jax.random.normal(k_hh, (H, H), dtype=jnp.float32))
    bound = (6.0 / (H + H)) ** 0.5
    w_ih = jax.random.uniform(k_ih, (H, H), minval=-bound, maxval=bound,
                              dtype=jnp.float32)
    bias = jnp.zeros((H,), dtype=jnp.float32)
    scale = jnp.ones((H,), dtype=jnp.float32)

    # ------------------------------------------------------------------
    # 1) Single-cell kernel, f32 MXU operands, all three solver methods.
    # ------------------------------------------------------------------
    B1 = 8
    new_hidden = jax.random.normal(k_x, (B1, H), dtype=jnp.float32)
    old_hidden = jax.random.normal(k_h, (B1, H), dtype=jnp.float32)

    for method in ("euler", "heun", "rk4"):
        out = ode_rnn_cell(new_hidden, old_hidden, ELAPSED, w_ih, w_hh, bias,
                           scale, num_unfolds=NUM_UNFOLDS, method=method,
                           mxu_dtype=jnp.float32)
        out = jax.block_until_ready(out)
        ref = ode_rnn_cell_ref(new_hidden, old_hidden, ELAPSED, w_ih, w_hh,
                               bias, scale, num_unfolds=NUM_UNFOLDS,
                               method=method)
        assert out.shape == (B1, H)
        assert jnp.allclose(out, ref, atol=1e-4, rtol=1e-4), \
            f"{method}: mismatch vs reference"

    # 2) Default bf16 MXU operands (f32 accumulation / f32 elementwise math).
    out_bf16 = ode_rnn_cell(new_hidden, old_hidden, ELAPSED, w_ih, w_hh, bias,
                            scale, num_unfolds=NUM_UNFOLDS, method="rk4")
    out_bf16 = jax.block_until_ready(out_bf16)
    ref_rk4 = ode_rnn_cell_ref(new_hidden, old_hidden, ELAPSED, w_ih, w_hh,
                               bias, scale, num_unfolds=NUM_UNFOLDS,
                               method="rk4")
    assert jnp.allclose(out_bf16, ref_rk4, atol=2e-1, rtol=2e-1), \
        "bf16 single-cell: mismatch vs reference"

    # ------------------------------------------------------------------
    # 3) Sequence-fused, time-chunked kernel (2 batch blocks, 3 time chunks,
    #    padded last chunk) in f32, then default bf16.
    # ------------------------------------------------------------------
    T, B = 10, 16
    xs = jax.random.normal(k_xs, (T, B, H), dtype=jnp.float32)
    h0 = jax.random.normal(k_h0, (B, H), dtype=jnp.float32)
    elapsed_seq = jax.random.uniform(k_e, (T,), minval=0.5, maxval=2.0,
                                     dtype=jnp.float32)

    ref_seq = ode_rnn_sequence_ref(xs, h0, elapsed_seq, w_ih, w_hh, bias,
                                   scale, num_unfolds=NUM_UNFOLDS,
                                   method="rk4")

    out_seq = ode_rnn_cell_sequence(xs, h0, elapsed_seq, w_ih, w_hh, bias,
                                    scale, num_unfolds=NUM_UNFOLDS,
                                    method="rk4", mxu_dtype=jnp.float32,
                                    time_block=4, batch_block=8)
    out_seq = jax.block_until_ready(out_seq)
    assert out_seq.shape == (T, B, H)
    assert jnp.allclose(out_seq, ref_seq, atol=3e-4, rtol=3e-4), \
        "f32 sequence: mismatch vs reference"

    out_seq_bf = ode_rnn_cell_sequence(xs, h0, elapsed_seq, w_ih, w_hh, bias,
                                       scale, num_unfolds=NUM_UNFOLDS,
                                       method="rk4")   # defaults: bf16, auto chunk
    out_seq_bf = jax.block_until_ready(out_seq_bf)
    assert jnp.allclose(out_seq_bf, ref_seq, atol=2e-1, rtol=2e-1), \
        "bf16 sequence: mismatch vs reference"

    print("KERNEL_OK")
</pallas_src>

<mosaic_0001>
module attributes {stable_mosaic.version = 11 : i64} {
  func.func @_ode_rnn_kernel(%arg0: memref<1xf32, #tpu.memory_space<smem>>, %arg1: memref<8x128xf32, #tpu.memory_space<vmem>>, %arg2: memref<8x128xf32, #tpu.memory_space<vmem>>, %arg3: memref<128x128xf32, #tpu.memory_space<vmem>>, %arg4: memref<128x128xf32, #tpu.memory_space<vmem>>, %arg5: memref<1x128xf32, #tpu.memory_space<vmem>>, %arg6: memref<1x128xf32, #tpu.memory_space<vmem>>, %arg7: memref<8x128xf32, #tpu.memory_space<vmem>>) attributes {dimension_semantics = [], scalar_prefetch = 0 : i64, scratch_operands = 0 : i64, tpu.core_type = #tpu.core_type<tc>} {
    %c0 = arith.constant 0 : index
    %0 = memref.load %arg0[%c0] : memref<1xf32, #tpu.memory_space<smem>>
    %c0_0 = arith.constant 0 : index
    %c0_1 = arith.constant 0 : index
    %1 = vector.load %arg4[%c0_0, %c0_1] : memref<128x128xf32, #tpu.memory_space<vmem>>, vector<128x128xf32>
    %c0_2 = arith.constant 0 : index
    %c0_3 = arith.constant 0 : index
    %2 = vector.load %arg6[%c0_2, %c0_3] : memref<1x128xf32, #tpu.memory_space<vmem>>, vector<1x128xf32>
    %3 = vector.shape_cast %2 : vector<1x128xf32> to vector<1x128xf32>
    %4 = vector.broadcast %3 : vector<1x128xf32> to vector<8x128xf32>
    %c0_4 = arith.constant 0 : index
    %c0_5 = arith.constant 0 : index
    %5 = vector.load %arg1[%c0_4, %c0_5] : memref<8x128xf32, #tpu.memory_space<vmem>>, vector<8x128xf32>
    %c0_6 = arith.constant 0 : index
    %c0_7 = arith.constant 0 : index
    %6 = vector.load %arg3[%c0_6, %c0_7] : memref<128x128xf32, #tpu.memory_space<vmem>>, vector<128x128xf32>
    %cst = arith.constant dense<0.000000e+00> : vector<8x128xf32>
    %7 = tpu.matmul %5, %6, %cst {dimension_numbers = #tpu.dot_dimension_numbers<[1], [0], [0], [1], [0, 0, 1, 1], [], []>} : vector<8x128xf32>, vector<128x128xf32>, vector<8x128xf32> -> vector<8x128xf32>
    %c0_8 = arith.constant 0 : index
    %c0_9 = arith.constant 0 : index
    %8 = vector.load %arg5[%c0_8, %c0_9] : memref<1x128xf32, #tpu.memory_space<vmem>>, vector<1x128xf32>
    %9 = vector.broadcast %8 : vector<1x128xf32> to vector<8x128xf32>
    %10 = arith.addf %7, %9 : vector<8x128xf32>
    %c0_10 = arith.constant 0 : index
    %c0_11 = arith.constant 0 : index
    %11 = vector.load %arg2[%c0_10, %c0_11] : memref<8x128xf32, #tpu.memory_space<vmem>>, vector<8x128xf32>
    %cst_12 = arith.constant dense<0.000000e+00> : vector<8x128xf32>
    %12 = tpu.matmul %11, %1, %cst_12 {dimension_numbers = #tpu.dot_dimension_numbers<[1], [0], [0], [1], [0, 0, 1, 1], [], []>} : vector<8x128xf32>, vector<128x128xf32>, vector<8x128xf32> -> vector<8x128xf32>
    %13 = arith.addf %10, %12 : vector<8x128xf32>
    %14 = math.tanh %13 : vector<8x128xf32>
    %15 = arith.mulf %4, %14 : vector<8x128xf32>
    %16 = arith.subf %15, %11 : vector<8x128xf32>
    %17 = vector.broadcast %0 : f32 to vector<8x128xf32>
    %18 = arith.mulf %17, %16 : vector<8x128xf32>
    %19 = arith.addf %11, %18 : vector<8x128xf32>
    %cst_13 = arith.constant dense<0.000000e+00> : vector<8x128xf32>
    %20 = tpu.matmul %19, %1, %cst_13 {dimension_numbers = #tpu.dot_dimension_numbers<[1], [0], [0], [1], [0, 0, 1, 1], [], []>} : vector<8x128xf32>, vector<128x128xf32>, vector<8x128xf32> -> vector<8x128xf32>
    %21 = arith.addf %10, %20 : vector<8x128xf32>
    %22 = math.tanh %21 : vector<8x128xf32>
    %23 = arith.mulf %4, %22 : vector<8x128xf32>
    %24 = arith.subf %23, %19 : vector<8x128xf32>
    %25 = vector.broadcast %0 : f32 to vector<8x128xf32>
    %26 = arith.mulf %25, %24 : vector<8x128xf32>
    %27 = arith.addf %19, %26 : vector<8x128xf32>
    %cst_14 = arith.constant dense<0.000000e+00> : vector<8x128xf32>
    %28 = tpu.matmul %27, %1, %cst_14 {dimension_numbers = #tpu.dot_dimension_numbers<[1], [0], [0], [1], [0, 0, 1, 1], [], []>} : vector<8x128xf32>, vector<128x128xf32>, vector<8x128xf32> -> vector<8x128xf32>
    %29 = arith.addf %10, %28 : vector<8x128xf32>
    %30 = math.tanh %29 : vector<8x128xf32>
    %31 = arith.mulf %4, %30 : vector<8x128xf32>
    %32 = arith.subf %31, %27 : vector<8x128xf32>
    %33 = vector.broadcast %0 : f32 to vector<8x128xf32>
    %34 = arith.mulf %33, %32 : vector<8x128xf32>
    %35 = arith.addf %27, %34 : vector<8x128xf32>
    %cst_15 = arith.constant dense<0.000000e+00> : vector<8x128xf32>
    %36 = tpu.matmul %35, %1, %cst_15 {dimension_numbers = #tpu.dot_dimension_numbers<[1], [0], [0], [1], [0, 0, 1, 1], [], []>} : vector<8x128xf32>, vector<128x128xf32>, vector<8x128xf32> -> vector<8x128xf32>
    %37 = arith.addf %10, %36 : vector<8x128xf32>
    %38 = math.tanh %37 : vector<8x128xf32>
    %39 = arith.mulf %4, %38 : vector<8x128xf32>
    %40 = arith.subf %39, %35 : vector<8x128xf32>
    %41 = vector.broadcast %0 : f32 to vector<8x128xf32>
    %42 = arith.mulf %41, %40 : vector<8x128xf32>
    %43 = arith.addf %35, %42 : vector<8x128xf32>
    %c0_16 = arith.constant 0 : index
    %c0_17 = arith.constant 0 : index
    %44 = vector.load %arg7[%c0_16, %c0_17] : memref<8x128xf32, #tpu.memory_space<vmem>>, vector<8x128xf32>
    tpu.vector_store %arg7[%c0_16, %c0_17], %43 {strides = array<i32>} : memref<8x128xf32, #tpu.memory_space<vmem>>, vector<8x128xf32>,
    return
  }
}

</mosaic_0001>

<bundles_post_ra>
// kernel: tpu_custom_call.1
= control target key start
LH: loop header
LB: loop body
LE: loop exit
PB: predicated region body
PF: predicated region fallthrough
CT: control target
= control target key end

     0   :  { %13 = vsyncpa [#allocation4], 0  ;;  %s1190_s0 = inlined_call_operand.<no memory space> [shape: f32[1], index: 0, kind: input, shape index: {}]   ;;  %s1191_s1 = inlined_call_operand.hbm [shape: f32[8,128], index: 1, kind: input, shape index: {}]   ;;  %s1192_s2 = inlined_call_operand.hbm [shape: f32[8,128], index: 2, kind: input, shape index: {}]   ;;  %s1193_s3 = inlined_call_operand.hbm [shape: f32[128,128], index: 3, kind: input, shape index: {}]   ;;  %s1194_s4 = inlined_call_operand.hbm [shape: f32[128,128], index: 4, kind: input, shape index: {}]   ;;  %s1195_s5 = inlined_call_operand.vmem [shape: f32[1,128], index: 5, kind: input, shape index: {}]   ;;  %s1196_s6 = inlined_call_operand.vmem [shape: f32[1,128], index: 6, kind: input, shape index: {}]   ;;  %s1197_s7 = inlined_call_operand.hbm [shape: f32[8,128], index: 7, kind: output, shape index: {}]  }
   0x1   :  { %14 = vsyncpa [#allocation7], 0 }
   0x2   :  { %15 = vsyncpa [#allocation10], 0 }
   0x3   :  { %16 = vsyncpa [#allocation5], 0  ;;  %s908_s24 = smov [#allocation6]   ;;  %s909_s26 = smov [#allocation3]  }
   0x4   :  { %s35_s25 = sshll.u32 %s908_s24, 4  ;;  %s25_s27 = sshll.u32 %s909_s26, 4  ;;  %s36_s25 = int_to_ptr.vmem [resolvable:$true] %s35_s25  ;;  %s26_s27 = int_to_ptr.vmem [resolvable:$true] %s25_s27 }
   0x5   :  { %s808_s28 = scalar_lea.vmem %s36_s25, 128  ;;  %p813_p1 = scmp.lt.s32.totalorder %s36_s25, %s36_s25 }
   0x6   :  { %p809_p0 = scmp.ne.s32.totalorder %s36_s25, %s808_s28  ;;  %p814_p2 = scmp.lt.s32.totalorder %s808_s28, %s808_s28 }
   0x8   :  { %p815_p3 = por %p814_p2, %p813_p1 }
   0xa   :  { %p816_p4 = pnand %p815_p3, %p809_p0 }
   0xc   :  { %819 = shalt.err (!%p816_p4)
}
   0xd   :  { %38 = dma.hbm_to_vmem [thread:$0]  %s1192_s2, 128, %s36_s25, [#allocation7]  }
   0xe   :  { %s828_s8 = scalar_lea.vmem %s26_s27, 128  ;;  %p833_p6 = scmp.lt.s32.totalorder %s26_s27, %s26_s27 }
   0xf   :  { %p829_p5 = scmp.ne.s32.totalorder %s26_s27, %s828_s8  ;;  %p834_p7 = scmp.lt.s32.totalorder %s828_s8, %s828_s8 }
  0x11   :  { %p835_p8 = por %p834_p7, %p833_p6 }
  0x13   :  { %p836_p9 = pnand %p835_p8, %p829_p5 }
  0x15   :  { %839 = shalt.err (!%p836_p9)
}
  0x16   :  { %28 = dma.hbm_to_vmem [thread:$0]  %s1191_s1, 128, %s26_s27, [#allocation4]  }
  0x17   :  { %s910_s11 = smov [#allocation8]  }
  0x18   :  { %s44_s12 = sshll.u32 %s910_s11, 4  ;;  %s45_s12 = int_to_ptr.vmem [resolvable:$true] %s44_s12 }
  0x19   :  { %s848_s13 = scalar_lea.vmem %s45_s12, 2048  ;;  %p853_p11 = scmp.lt.s32.totalorder %s45_s12, %s45_s12 }
  0x1a   :  { %p849_p10 = scmp.ne.s32.totalorder %s45_s12, %s848_s13  ;;  %p854_p12 = scmp.lt.s32.totalorder %s848_s13, %s848_s13 }
  0x1c   :  { %p855_p13 = por %p854_p12, %p853_p11 }
  0x1e   :  { %p856_p0 = pnand %p855_p13, %p849_p10 }
  0x20   :  { %859 = shalt.err (!%p856_p0)
}
  0x21   :  { %s911_s2 = smov 128   ;;  %s912_s14 = smov 8  }
  0x22   :  { %50 = dma.hbm_to_vmem [thread:$0]  %s1193_s3, 2048, %s45_s12, [#allocation7], %s911_s2, %s911_s2, %s912_s14  }
  0x23   :  { %s913_s17 = smov [#allocation9]  }
  0x24   :  { %s56_s18 = sshll.u32 %s913_s17, 4  ;;  %s57_s18 = int_to_ptr.vmem [resolvable:$true] %s56_s18 }
  0x25   :  { %s868_s1 = scalar_lea.vmem %s57_s18, 2048  ;;  %p873_p2 = scmp.lt.s32.totalorder %s57_s18, %s57_s18 }
  0x26   :  { %p869_p1 = scmp.ne.s32.totalorder %s57_s18, %s868_s1  ;;  %p874_p3 = scmp.lt.s32.totalorder %s868_s1, %s868_s1 }
  0x28   :  { %p875_p4 = por %p874_p3, %p873_p2 }
  0x2a   :  { %p876_p5 = pnand %p875_p4, %p869_p1 }
  0x2c   :  { %879 = shalt.err (!%p876_p5)
}
  0x2d   :  { %62 = dma.hbm_to_vmem [thread:$0]  %s1194_s4, 2048, %s57_s18, [#allocation10], %s911_s2, %s911_s2, %s912_s14  }
  0x2e   :  { %900 = dma.done.wait [#allocation4], 128  }
  0x2f   :  { %901 = vsyncadd [#allocation4], 4294967168 }
  0x30   :  { %902 = dma.done.wait [#allocation7], 2176  }
  0x31   :  { %903 = vsyncadd [#allocation7], 4294965120 }
  0x32   :  { %904 = dma.done.wait [#allocation10], 2048  }
  0x33   :  { %905 = vsyncadd [#allocation10], 4294965248  ;;  %v914_v0 = vmov 0.0   ;;  %vm915_vm0 = vmmov 0   ;;  %v119_v1 = vld [vmem:[#allocation8 + $0x78] sm:$0xff]  ;;  %v118_v3 = vld [vmem:[#allocation8 + $0x70] sm:$0xff]  ;;  %v1140_v45 = vstv %s1190_s0 }
  0x34   :  { %608 = vmatprep.subr.mxu0 %v914_v0  ;;  %643 = vmatprep.subr.mxu1 %v914_v0  ;;  %v975_v2 = vld [vmem:[#allocation9 + $0x78] sm:$0xff]  ;;  %v978_v4 = vld [vmem:[#allocation9 + $0x70] sm:$0xff]  ;;  %v117_v5 = vld [vmem:[#allocation8 + $0x68] sm:$0xff]  ;;  %s916_s0 = smov [#allocation11]  }
  0x35   :  { %640 = vmatprep.mubr.msk.f32.mxu0 %vm915_vm0, %v914_v0  ;;  %675 = vmatprep.mubr.msk.f32.mxu1 %vm915_vm0, %v914_v0  ;;  %v982_v6 = vld [vmem:[#allocation9 + $0x68] sm:$0xff]  ;;  %v116_v7 = vld [vmem:[#allocation8 + $0x60] sm:$0xff]  ;;  %v115_v9 = vld [vmem:[#allocation8 + $0x58] sm:$0xff] }
  0x36   :  { %609 = vmatpush3.msra.mxu0 %v119_v1  ;;  %644 = vmatpush3.msra.mxu1 %v975_v2  ;;  %v987_v8 = vld [vmem:[#allocation9 + $0x60] sm:$0xff]  ;;  %v992_v10 = vld [vmem:[#allocation9 + $0x58] sm:$0xff]  ;;  %v114_v11 = vld [vmem:[#allocation8 + $0x50] sm:$0xff] }
  0x37   :  { %610 = vmatprep.subr.mxu0 %v914_v0  ;;  %645 = vmatprep.subr.mxu1 %v914_v0  ;;  %v997_v12 = vld [vmem:[#allocation9 + $0x50] sm:$0xff]  ;;  %v113_v13 = vld [vmem:[#allocation8 + $0x48] sm:$0xff]  ;;  %v112_v15 = vld [vmem:[#allocation8 + $0x40] sm:$0xff] }
  0x38   :  { %611 = vmatpush3.msra.mxu0 %v118_v3  ;;  %646 = vmatpush3.msra.mxu1 %v978_v4  ;;  %v1002_v14 = vld [vmem:[#allocation9 + $0x48] sm:$0xff]  ;;  %v1007_v16 = vld [vmem:[#allocation9 + $0x40] sm:$0xff]  ;;  %v111_v17 = vld [vmem:[#allocation8 + $0x38] sm:$0xff] }
  0x39   :  { %612 = vmatprep.subr.mxu0 %v914_v0  ;;  %647 = vmatprep.subr.mxu1 %v914_v0  ;;  %v1012_v18 = vld [vmem:[#allocation9 + $0x38] sm:$0xff]  ;;  %v110_v19 = vld [vmem:[#allocation8 + $0x30] sm:$0xff]  ;;  %v109_v21 = vld [vmem:[#allocation8 + $0x28] sm:$0xff] }
  0x3a   :  { %613 = vmatpush3.msra.mxu0 %v117_v5  ;;  %648 = vmatpush3.msra.mxu1 %v982_v6  ;;  %v1017_v20 = vld [vmem:[#allocation9 + $0x30] sm:$0xff]  ;;  %v1022_v22 = vld [vmem:[#allocation9 + $0x28] sm:$0xff]  ;;  %v108_v23 = vld [vmem:[#allocation8 + $0x20] sm:$0xff] }
  0x3b   :  { %614 = vmatprep.subr.mxu0 %v914_v0  ;;  %649 = vmatprep.subr.mxu1 %v914_v0  ;;  %v1027_v24 = vld [vmem:[#allocation9 + $0x20] sm:$0xff]  ;;  %v107_v25 = vld [vmem:[#allocation8 + $0x18] sm:$0xff]  ;;  %v106_v27 = vld [vmem:[#allocation8 + $0x10] sm:$0xff] }
  0x3c   :  { %615 = vmatpush3.msra.mxu0 %v116_v7  ;;  %650 = vmatpush3.msra.mxu1 %v987_v8  ;;  %v1032_v26 = vld [vmem:[#allocation9 + $0x18] sm:$0xff]  ;;  %v1037_v28 = vld [vmem:[#allocation9 + $0x10] sm:$0xff]  ;;  %v105_v29 = vld [vmem:[#allocation8 + $0x8] sm:$0xff] }
  0x3d   :  { %616 = vmatprep.subr.mxu0 %v914_v0  ;;  %651 = vmatprep.subr.mxu1 %v914_v0  ;;  %v1042_v30 = vld [vmem:[#allocation9 + $0x8] sm:$0xff]  ;;  %v104_v31 = vld [vmem:[#allocation8] sm:$0xff]  ;;  %v103_v33 = vld [vmem:[#allocation3] sm:$0xff] }
  0x3e   :  { %617 = vmatpush3.msra.mxu0 %v115_v9  ;;  %652 = vmatpush3.msra.mxu1 %v992_v10  ;;  %v1047_v32 = vld [vmem:[#allocation9] sm:$0xff]  ;;  %v1050_v34 = vld [vmem:[#allocation6] sm:$0xff]  ;;  %v522_v35 = vld [vmem:[%s1195_s5] ss:$0 sm:$0xff]  ;;  %s510_s5 = sshll.u32 %s916_s0, 4  ;;  %s511_s5 = int_to_ptr.vmem [resolvable:$true] %s510_s5 }
  0x3f   :  { %618 = vmatprep.subr.mxu0 %v914_v0  ;;  %653 = vmatprep.subr.mxu1 %v914_v0  ;;  %v1134_v42 = vld [vmem:[%s1196_s6] ss:$0 sm:$0xff]  ;;  %s880_s6 = scalar_lea.vmem %s511_s5, 128  ;;  %p885_p7 = scmp.lt.s32.totalorder %s511_s5, %s511_s5 }
  0x40   :  { %619 = vmatpush3.msra.mxu0 %v114_v11  ;;  %654 = vmatpush3.msra.mxu1 %v997_v12  ;;  %p881_p6 = scmp.ne.s32.totalorder %s511_s5, %s880_s6  ;;  %p886_p8 = scmp.lt.s32.totalorder %s880_s6, %s880_s6 }
  0x41   :  { %620 = vmatprep.subr.mxu0 %v914_v0  ;;  %655 = vmatprep.subr.mxu1 %v914_v0 }
  0x42   :  { %621 = vmatpush3.msra.mxu0 %v113_v13  ;;  %656 = vmatpush3.msra.mxu1 %v1002_v14  ;;  %p887_p9 = por %p886_p8, %p885_p7 }
  0x43   :  { %622 = vmatprep.subr.mxu0 %v914_v0  ;;  %657 = vmatprep.subr.mxu1 %v914_v0 }
  0x44   :  { %623 = vmatpush3.msra.mxu0 %v112_v15  ;;  %658 = vmatpush3.msra.mxu1 %v1007_v16  ;;  %p888_p10 = pnand %p887_p9, %p881_p6 }
  0x45   :  { %624 = vmatprep.subr.mxu0 %v914_v0  ;;  %659 = vmatprep.subr.mxu1 %v914_v0 }
  0x46   :  { %625 = vmatpush3.msra.mxu0 %v111_v17  ;;  %660 = vmatpush3.msra.mxu1 %v1012_v18 }
  0x47   :  { %626 = vmatprep.subr.mxu0 %v914_v0  ;;  %661 = vmatprep.subr.mxu1 %v914_v0 }
  0x48   :  { %627 = vmatpush3.msra.mxu0 %v110_v19  ;;  %662 = vmatpush3.msra.mxu1 %v1017_v20 }
  0x49   :  { %628 = vmatprep.subr.mxu0 %v914_v0  ;;  %663 = vmatprep.subr.mxu1 %v914_v0 }
  0x4a   :  { %629 = vmatpush3.msra.mxu0 %v109_v21  ;;  %664 = vmatpush3.msra.mxu1 %v1022_v22 }
  0x4b   :  { %630 = vmatprep.subr.mxu0 %v914_v0  ;;  %665 = vmatprep.subr.mxu1 %v914_v0 }
  0x4c   :  { %631 = vmatpush3.msra.mxu0 %v108_v23  ;;  %666 = vmatpush3.msra.mxu1 %v1027_v24 }
  0x4d   :  { %632 = vmatprep.subr.mxu0 %v914_v0  ;;  %667 = vmatprep.subr.mxu1 %v914_v0 }
  0x4e   :  { %633 = vmatpush3.msra.mxu0 %v107_v25  ;;  %668 = vmatpush3.msra.mxu1 %v1032_v26 }
  0x4f   :  { %634 = vmatprep.subr.mxu0 %v914_v0  ;;  %669 = vmatprep.subr.mxu1 %v914_v0 }
  0x50   :  { %635 = vmatpush3.msra.mxu0 %v106_v27  ;;  %670 = vmatpush3.msra.mxu1 %v1037_v28 }
  0x51   :  { %636 = vmatprep.subr.mxu0 %v914_v0  ;;  %671 = vmatprep.subr.mxu1 %v914_v0 }
  0x52   :  { %637 = vmatpush3.msra.mxu0 %v105_v29  ;;  %672 = vmatpush3.msra.mxu1 %v1042_v30 }
  0x53   :  { %638 = vmatprep.subr.mxu0 %v914_v0  ;;  %673 = vmatprep.subr.mxu1 %v914_v0 }
  0x54   :  { %639 = vmatpush3.msra.mxu0 %v104_v31  ;;  %674 = vmatpush3.msra.mxu1 %v1047_v32 }
  0x55   :  { %641 = vmatmul.mubr.f32.vlgmr.msra.gmra.mxu0 %v103_v33  ;;  %676 = vmatmul.mubr.f32.vlgmr.msra.gmra.mxu1 %v1050_v34 }
  0x56   :  { %678 = vmatprep.subr.mxu0 %v914_v0  ;;  %710 = vmatprep.mubr.msk.f32.mxu0 %vm915_vm0, %v914_v0 }
  0x57   :  { %679 = vmatpush3.msra.mxu0 %v975_v2  ;;  %713 = vmatprep.subr.mxu1 %v914_v0 }
  0x58   :  { %680 = vmatprep.subr.mxu0 %v914_v0  ;;  %714 = vmatpush3.msra.mxu1 %v975_v2 }
  0x59   :  { %681 = vmatpush3.msra.mxu0 %v978_v4  ;;  %715 = vmatprep.subr.mxu1 %v914_v0 }
  0x5a   :  { %682 = vmatprep.subr.mxu0 %v914_v0  ;;  %716 = vmatpush3.msra.mxu1 %v978_v4 }
  0x5b   :  { %683 = vmatpush3.msra.mxu0 %v982_v6  ;;  %717 = vmatprep.subr.mxu1 %v914_v0 }
  0x5c   :  { %684 = vmatprep.subr.mxu0 %v914_v0  ;;  %718 = vmatpush3.msra.mxu1 %v982_v6 }
  0x5d   :  { %685 = vmatpush3.msra.mxu0 %v987_v8  ;;  %719 = vmatprep.subr.mxu1 %v914_v0 }
  0x5e   :  { %686 = vmatprep.subr.mxu0 %v914_v0  ;;  %720 = vmatpush3.msra.mxu1 %v987_v8 }
  0x5f   :  { %687 = vmatpush3.msra.mxu0 %v992_v10  ;;  %721 = vmatprep.subr.mxu1 %v914_v0 }
  0x60   :  { %688 = vmatprep.subr.mxu0 %v914_v0  ;;  %722 = vmatpush3.msra.mxu1 %v992_v10 }
  0x61   :  { %689 = vmatpush3.msra.mxu0 %v997_v12  ;;  %723 = vmatprep.subr.mxu1 %v914_v0 }
  0x62   :  { %690 = vmatprep.subr.mxu0 %v914_v0  ;;  %724 = vmatpush3.msra.mxu1 %v997_v12 }
  0x63   :  { %691 = vmatpush3.msra.mxu0 %v1002_v14  ;;  %725 = vmatprep.subr.mxu1 %v914_v0 }
  0x64   :  { %692 = vmatprep.subr.mxu0 %v914_v0  ;;  %726 = vmatpush3.msra.mxu1 %v1002_v14 }
  0x65   :  { %693 = vmatpush3.msra.mxu0 %v1007_v16  ;;  %727 = vmatprep.subr.mxu1 %v914_v0 }
  0x66   :  { %694 = vmatprep.subr.mxu0 %v914_v0  ;;  %728 = vmatpush3.msra.mxu1 %v1007_v16 }
  0x67   :  { %695 = vmatpush3.msra.mxu0 %v1012_v18  ;;  %729 = vmatprep.subr.mxu1 %v914_v0 }
  0x68   :  { %696 = vmatprep.subr.mxu0 %v914_v0  ;;  %730 = vmatpush3.msra.mxu1 %v1012_v18 }
  0x69   :  { %697 = vmatpush3.msra.mxu0 %v1017_v20  ;;  %731 = vmatprep.subr.mxu1 %v914_v0 }
  0x6a   :  { %698 = vmatprep.subr.mxu0 %v914_v0  ;;  %732 = vmatpush3.msra.mxu1 %v1017_v20 }
  0x6b   :  { %699 = vmatpush3.msra.mxu0 %v1022_v22  ;;  %733 = vmatprep.subr.mxu1 %v914_v0 }
  0x6c   :  { %700 = vmatprep.subr.mxu0 %v914_v0  ;;  %734 = vmatpush3.msra.mxu1 %v1022_v22 }
  0x6d   :  { %701 = vmatpush3.msra.mxu0 %v1027_v24  ;;  %735 = vmatprep.subr.mxu1 %v914_v0 }
  0x6e   :  { %702 = vmatprep.subr.mxu0 %v914_v0  ;;  %736 = vmatpush3.msra.mxu1 %v1027_v24 }
  0x6f   :  { %703 = vmatpush3.msra.mxu0 %v1032_v26  ;;  %737 = vmatprep.subr.mxu1 %v914_v0 }
  0x70   :  { %704 = vmatprep.subr.mxu0 %v914_v0  ;;  %738 = vmatpush3.msra.mxu1 %v1032_v26 }
  0x71   :  { %705 = vmatpush3.msra.mxu0 %v1037_v28  ;;  %739 = vmatprep.subr.mxu1 %v914_v0 }
  0x72   :  { %706 = vmatprep.subr.mxu0 %v914_v0  ;;  %740 = vmatpush3.msra.mxu1 %v1037_v28 }
  0x73   :  { %707 = vmatpush3.msra.mxu0 %v1042_v30  ;;  %741 = vmatprep.subr.mxu1 %v914_v0 }
  0x74   :  { %708 = vmatprep.subr.mxu0 %v914_v0  ;;  %742 = vmatpush3.msra.mxu1 %v1042_v30 }
  0x75   :  { %709 = vmatpush3.msra.mxu0 %v1047_v32  ;;  %743 = vmatprep.subr.mxu1 %v914_v0 }
  0x76   :  { %744 = vmatpush3.msra.mxu1 %v1047_v32  ;;  %745 = vmatprep.mubr.msk.f32.mxu1 %vm915_vm0, %v914_v0 }
  0x77   :  { %748 = vmatprep.subr.mxu0 %v914_v0 }
 0x115   :  { %v193_v36 = vpop.f32.mrf.mxu0  ;;  %v264_v37 = vpop.f32.mrf.mxu1 }
 0x116   :  { %v1128_v38 = vadd.f32 %v522_v35, %v193_v36 }
 0x117   :  { %v642_v39 = vpop.f32.mrf.mxu0  ;;  %v677_v40 = vpop.f32.mrf.mxu1 }
 0x118   :  { %v268_v41 = vadd.f32 %v264_v37, %v1128_v38 }
 0x11a   :  { %792 = vtanh.f32 %v268_v41 }
 0x127   :  { %v793_v43 = vpop.eup %792 }
 0x128   :  { %v270_v44 = vmul.f32 %v793_v43, %v1134_v42 }
 0x12a   :  { %v271_v46 = vsub.f32 %v270_v44, %v1050_v34 }
 0x12c   :  { %v273_v47 = vmul.f32 %v1140_v45, %v271_v46 }
 0x12e   :  { %v274_v48 = vadd.f32 %v273_v47, %v1050_v34 }
 0x130   :  { %711 = vmatmul.mubr.f32.vlgmr.msra.gmra.mxu0 %v274_v48 }
 0x131   :  { %749 = vmatpush3.msra.mxu0 %v975_v2  ;;  %780 = vmatprep.mubr.msk.f32.mxu0 %vm915_vm0, %v914_v0 }
 0x132   :  { %750 = vmatprep.subr.mxu0 %v914_v0 }
 0x133   :  { %751 = vmatpush3.msra.mxu0 %v978_v4 }
 0x134   :  { %752 = vmatprep.subr.mxu0 %v914_v0 }
 0x135   :  { %753 = vmatpush3.msra.mxu0 %v982_v6 }
 0x136   :  { %754 = vmatprep.subr.mxu0 %v914_v0 }
 0x137   :  { %755 = vmatpush3.msra.mxu0 %v987_v8 }
 0x138   :  { %756 = vmatprep.subr.mxu0 %v914_v0 }
 0x139   :  { %757 = vmatpush3.msra.mxu0 %v992_v10 }
 0x13a   :  { %758 = vmatprep.subr.mxu0 %v914_v0 }
 0x13b   :  { %759 = vmatpush3.msra.mxu0 %v997_v12 }
 0x13c   :  { %760 = vmatprep.subr.mxu0 %v914_v0 }
 0x13d   :  { %761 = vmatpush3.msra.mxu0 %v1002_v14 }
 0x13e   :  { %762 = vmatprep.subr.mxu0 %v914_v0 }
 0x13f   :  { %763 = vmatpush3.msra.mxu0 %v1007_v16 }
 0x140   :  { %764 = vmatprep.subr.mxu0 %v914_v0 }
 0x141   :  { %765 = vmatpush3.msra.mxu0 %v1012_v18 }
 0x142   :  { %766 = vmatprep.subr.mxu0 %v914_v0 }
 0x143   :  { %767 = vmatpush3.msra.mxu0 %v1017_v20 }
 0x144   :  { %768 = vmatprep.subr.mxu0 %v914_v0 }
 0x145   :  { %769 = vmatpush3.msra.mxu0 %v1022_v22 }
 0x146   :  { %770 = vmatprep.subr.mxu0 %v914_v0 }
 0x147   :  { %771 = vmatpush3.msra.mxu0 %v1027_v24 }
 0x148   :  { %772 = vmatprep.subr.mxu0 %v914_v0 }
 0x149   :  { %773 = vmatpush3.msra.mxu0 %v1032_v26 }
 0x14a   :  { %774 = vmatprep.subr.mxu0 %v914_v0 }
 0x14b   :  { %775 = vmatpush3.msra.mxu0 %v1037_v28 }
 0x14c   :  { %776 = vmatprep.subr.mxu0 %v914_v0 }
 0x14d   :  { %777 = vmatpush3.msra.mxu0 %v1042_v30 }
 0x14e   :  { %778 = vmatprep.subr.mxu0 %v914_v0 }
 0x14f   :  { %779 = vmatpush3.msra.mxu0 %v1047_v32 }
 0x1f0   :  { %v341_v49 = vpop.f32.mrf.mxu0 }
 0x1f1   :  { %v345_v50 = vadd.f32 %v341_v49, %v1128_v38 }
 0x1f2   :  { %v712_v51 = vpop.f32.mrf.mxu0 }
 0x1f3   :  { %794 = vtanh.f32 %v345_v50 }
 0x200   :  { %v795_v52 = vpop.eup %794 }
 0x201   :  { %v347_v53 = vmul.f32 %v795_v52, %v1134_v42 }
 0x203   :  { %v348_v54 = vsub.f32 %v347_v53, %v274_v48 }
 0x205   :  { %v349_v55 = vmul.f32 %v348_v54, %v1140_v45 }
 0x207   :  { %v350_v56 = vadd.f32 %v349_v55, %v274_v48 }
 0x209   :  { %746 = vmatmul.mubr.f32.vlgmr.msra.gmra.mxu1 %v350_v56 }
 0x2c9   :  { %v417_v57 = vpop.f32.mrf.mxu1 }
 0x2ca   :  { %v421_v58 = vadd.f32 %v417_v57, %v1128_v38 }
 0x2cb   :  { %v747_v59 = vpop.f32.mrf.mxu1 }
 0x2cc   :  { %796 = vtanh.f32 %v421_v58 }
 0x2d9   :  { %v797_v60 = vpop.eup %796 }
 0x2da   :  { %v423_v61 = vmul.f32 %v797_v60, %v1134_v42 }
 0x2dc   :  { %v424_v62 = vsub.f32 %v423_v61, %v350_v56 }
 0x2de   :  { %v425_v63 = vmul.f32 %v424_v62, %v1140_v45 }
 0x2e0   :  { %v426_v0 = vadd.f32 %v425_v63, %v350_v56 }
 0x2e2   :  { %781 = vmatmul.mubr.f32.vlgmr.msra.gmra.mxu0 %v426_v0 }
 0x3a2   :  { %v493_v1 = vpop.f32.mrf.mxu0 }
 0x3a3   :  { %v497_v2 = vadd.f32 %v493_v1, %v1128_v38 }
 0x3a4   :  { %v782_v3 = vpop.f32.mrf.mxu0 }
 0x3a5   :  { %798 = vtanh.f32 %v497_v2 }
 0x3b2   :  { %v799_v4 = vpop.eup %798 }
 0x3b3   :  { %v499_v5 = vmul.f32 %v799_v4, %v1134_v42 }
 0x3b5   :  { %v500_v6 = vsub.f32 %v499_v5, %v426_v0 }
 0x3b7   :  { %v501_v7 = vmul.f32 %v500_v6, %v1140_v45 }
 0x3b9   :  { %v502_v8 = vadd.f32 %v501_v7, %v426_v0 }
 0x3bb   :  { %503 = vst [vmem:[#allocation11] sm:$0xff] %v502_v8 }
 0x3bc   :  { %891 = shalt.err (!%p888_p10)
}
 0x3bd   :  { %513 = dma.vmem_to_hbm [thread:$0]  %s511_s5, 128, %s1197_s7, [#allocation5]  }
 0x3be   :  { %906 = dma.done.wait [#allocation5], 128  }
 0x3bf   :  { %907 = vsyncadd [#allocation5], 4294967168 }
 0x3c0   :  { %517 = vsyncpa [#allocation4], 1 }
 0x3c1   :  { %518 = vsyncpa [#allocation7], 1 }
 0x3c2   :  { %519 = vsyncpa [#allocation10], 1 }
 0x3c3   :  { %520 = vsyncpa [#allocation5], 1 }

</bundles_post_ra>
